<compile_context>
chip_gen: v5e
topology: v5e:2x2
jax: 0.10.0
libtpu: 0.0.40
codegen_flags: <defaults>
</compile_context>

<pallas_src>
import jax
import jax.numpy as jnp
from jax.experimental import pallas as pl
from jax.experimental.pallas import tpu as pltpu

LANE = 128


def _largest_divisor_le(n, cap):
    cap = max(1, min(cap, n))
    for d in range(cap, 0, -1):
        if n % d == 0:
            return d
    return 1


def _sublane_multiple(*dtypes):
    """Sublane granularity so blocks land on native packed tiles (8/16/32)."""
    m = 8
    for dt in dtypes:
        m = max(m, 32 // max(1, jnp.dtype(dt).itemsize))
    return m


def _vmem_capacity_bytes():
    try:
        return int(pltpu.get_tpu_info().vmem_capacity_bytes)
    except Exception:
        return 64 << 20        # conservative: assume a 64 MiB-per-core part


def _plan_rows(R, sub, cap, want_two):
    """Split R rows (of 128 lanes) into G groups x T tiles x tr rows.

    Returns (G, tr, T, Rp) with Rp = G*T*tr >= R; rows R..Rp-1 are zero padding
    (mask == 0 there, so they contribute to neither sum nor count).
    """
    cap = max(sub, (cap // sub) * sub)

    def best_tr(rows, groups):
        # Largest tr <= cap, multiple of sub, with groups*tr dividing rows.
        t = min(cap, (rows // groups // sub) * sub)
        while t >= sub:
            if rows % (groups * t) == 0:
                return t
            t -= sub
        return 0

    if want_two and R >= 2 * sub:
        # (a) clean halving, one tile per group, no padding
        if R % 2 == 0 and (R // 2) <= cap and (R // 2) % sub == 0:
            return 2, R // 2, 1, R
        # (b) divisor-based split into 2 groups x T tiles, no padding
        tr = best_tr(R, 2)
        if tr >= max(sub, cap // 8):
            return 2, tr, R // (2 * tr), R
        # (c) small padding (<= 12.5% extra HBM traffic) to get 2 groups
        tr = min(cap, -(-R // (2 * sub)) * sub)
        Rp = -(-R // (2 * tr)) * (2 * tr)
        if (Rp - R) * 8 <= R:
            return 2, tr, Rp // (2 * tr), Rp
        # otherwise give up on the second parallel group

    if R <= cap:
        return 1, R, 1, R              # full extent: always layout-legal
    tr = best_tr(R, 1)
    if tr >= max(sub, cap // 8):
        return 1, tr, R // tr, R
    # No decent divisor: pad up to a multiple of cap.  Bounds VMEM
    # deterministically; waste < cap rows, which is small since R > cap here.
    Rp = -(-R // cap) * cap
    return 1, cap, Rp // cap, Rp


def _aleatoric_kernel(x_ref, s_ref, y_ref, m_ref, sum_ref, cnt_ref):
    # Grid = (batch_tiles [parallel], row_groups [parallel], row_tiles [arbitrary]);
    # each (batch_tile, row_group) owns its own (1,1,128) accumulator block, which
    # stays VMEM-resident across the innermost reduction axis.
    t = pl.program_id(2)

    @pl.when(t == 0)
    def _init():
        sum_ref[...] = jnp.zeros_like(sum_ref)
        cnt_ref[...] = jnp.zeros_like(cnt_ref)

    # In-kernel promotion: inputs may be bf16 / int8 etc. (narrow HBM traffic).
    x = x_ref[...].astype(jnp.float32)
    s = s_ref[...].astype(jnp.float32)
    y = y_ref[...].astype(jnp.float32)
    sel = m_ref[...].astype(jnp.float32) == 1.0     # PyTorch's `mask == 1`

    # Zero s and (x - y) under the mask BEFORE exp, so stray values can never
    # produce inf/NaN; the unselected term is then exactly 0 (exp(0)*0 + 0).
    s_safe = jnp.where(sel, s, 0.0)
    diff = jnp.where(sel, x - y, 0.0)
    term = jnp.exp(-s_safe) * jnp.abs(diff) + s_safe    # exp -> EUP, rest -> VPU

    # Reduce batch/sublane axes only; lanes stay live (no per-step cross-lane
    # pass, no sub-128 store).
    sum_ref[...] += jnp.sum(term, axis=(0, 1), keepdims=True)
    cnt_ref[...] += jnp.sum(sel.astype(jnp.float32), axis=(0, 1), keepdims=True)


def aleatoric_loss(x, y, mask, *, max_tile_rows=None):
    """Pallas implementation of Aleatoric_Loss.forward. Returns a float32 scalar."""
    N, C, H, W = x.shape
    assert C == 2, "x must have 2 channels: [prediction, ln(sigma^2)]"
    P = H * W

    # Bool masks don't stream cleanly; reinterpret as int8 (tiny one-off cast).
    # Callers should pass int8 masks (and bf16 x/y) directly for minimum traffic.
    if mask.dtype == jnp.bool_:
        mask = mask.astype(jnp.int8)

    x_item = jnp.dtype(x.dtype).itemsize
    y_item = jnp.dtype(y.dtype).itemsize
    m_item = jnp.dtype(mask.dtype).itemsize
    sub = _sublane_multiple(x.dtype, y.dtype, mask.dtype)

    # --- generation-aware VMEM / tile budget --------------------------------
    phys = _vmem_capacity_bytes()
    if phys >= (100 << 20):      # v5e / v6e: 128 MiB VMEM
        buffer_budget, limit_ceiling, auto_rows = 64 << 20, 96 << 20, 16384
    else:                        # v7x-class: 64 MiB per TensorCore
        buffer_budget, limit_ceiling, auto_rows = 36 << 20, 48 << 20, 8192

    bytes_per_row = LANE * (2 * x_item + y_item + m_item)     # x streamed twice
    cap_rows = buffer_budget // (2 * bytes_per_row)           # double-buffered
    cap_rows = min(cap_rows, auto_rows if max_tile_rows is None else max_tile_rows)
    cap_rows = max(1, cap_rows)

    # --- tiling plan ----------------------------------------------------------
    R = -(-P // LANE)                                   # rows of 128 lanes / batch
    tb = _largest_divisor_le(N, max(1, cap_rows // sub))
    n_bt = N // tb
    tr_cap = max(sub, ((cap_rows // tb) // sub) * sub)
    # When the batch alone gives only one parallel block, split rows into two
    # parallel groups so both v7x TensorCores get work (harmless on v5e/v6e).
    G, tr, T, Rp = _plan_rows(R, sub, tr_cap, want_two=(n_bt == 1))

    # --- lay the data out as (..., rows, 128); reshapes are free for NCHW ----
    xr = x.reshape(N, 2, P)
    yr = y.reshape(N, P)
    mr = mask.reshape(N, P)
    pad = Rp * LANE - P
    if pad:
        # TODO(synk): ragged H*W (and no-divisor row counts) still take a jnp.pad,
        # i.e. one extra HBM round trip for that case; in-kernel iota tail-masking
        # on a flat layout would remove it.  Padded tail carries mask == 0, so it
        # contributes to neither the sum nor the count.
        xr = jnp.pad(xr, ((0, 0), (0, 0), (0, pad)))
        yr = jnp.pad(yr, ((0, 0), (0, pad)))
        mr = jnp.pad(mr, ((0, 0), (0, pad)))
    X = xr.reshape(N, 2, Rp, LANE)
    Y = yr.reshape(N, Rp, LANE)
    M = mr.reshape(N, Rp, LANE)

    # --- VMEM limit in lockstep with the actual block size -------------------
    block_bytes = tb * tr * bytes_per_row
    vmem_limit = int(min(limit_ceiling, max(32 << 20, 2 * block_bytes + (8 << 20))))

    # x passed twice; the channel (prediction vs ln(sigma^2)) is selected by the
    # squeezed channel dim in the index_map -- no strided-slice copy in HBM.
    chan_block = (tb, None, tr, LANE)
    flat_block = (tb, tr, LANE)
    out_spec = pl.BlockSpec((1, 1, LANE), lambda b, g, t: (b * G + g, 0, 0))

    sums, cnts = pl.pallas_call(
        _aleatoric_kernel,
        out_shape=(
            jax.ShapeDtypeStruct((n_bt * G, 1, LANE), jnp.float32),
            jax.ShapeDtypeStruct((n_bt * G, 1, LANE), jnp.float32),
        ),
        grid_spec=pltpu.PrefetchScalarGridSpec(
            num_scalar_prefetch=0,
            grid=(n_bt, G, T),
            in_specs=[
                pl.BlockSpec(chan_block, lambda b, g, t: (b, 0, g * T + t, 0)),  # pred
                pl.BlockSpec(chan_block, lambda b, g, t: (b, 1, g * T + t, 0)),  # ln(sig^2)
                pl.BlockSpec(flat_block, lambda b, g, t: (b, g * T + t, 0)),     # target
                pl.BlockSpec(flat_block, lambda b, g, t: (b, g * T + t, 0)),     # mask
            ],
            out_specs=[out_spec, out_spec],
        ),
        compiler_params=pltpu.CompilerParams(
            dimension_semantics=("parallel", "parallel", "arbitrary"),
            vmem_limit_bytes=vmem_limit,
        ),
    )(X, X, Y, M)

    total = jnp.sum(sums)
    count = jnp.sum(cnts)
    # TODO(synk): PyTorch returns None when the mask is empty; we return NaN.
    # Counts accumulate in f32 lanes: exact up to 2^24 masked pixels per lane per
    # (batch-tile, row-group) accumulator -- far beyond any image workload.
    return jnp.where(count != 0.0, total / count, jnp.nan)


def _reference(x, y, mask):
    x0 = x[:, 0:1].astype(jnp.float32)
    s = x[:, 1:2].astype(jnp.float32)
    m = mask.astype(jnp.float32) == 1.0
    d = jnp.sum(m.astype(jnp.float32))
    num = jnp.sum(
        jnp.where(m, jnp.exp(-s) * jnp.abs(x0 - y.astype(jnp.float32)) + s, 0.0)
    )
    return num / d


if __name__ == "__main__":
    key = jax.random.PRNGKey(0)

    def make(shape, xdt, ydt, mdt, k):
        n, h, w = shape
        k1, k2, k3 = jax.random.split(k, 3)
        x = jax.random.normal(k1, (n, 2, h, w), dtype=xdt)
        y = jax.random.normal(k2, (n, 1, h, w), dtype=ydt)
        mask = (jax.random.uniform(k3, (n, 1, h, w)) > 0.5).astype(mdt)
        return x, y, mask

    cases = [
        ((2, 16, 16), jnp.float32, jnp.float32, jnp.int32, {}),                    # single tile
        ((2, 64, 64), jnp.float32, jnp.float32, jnp.int32, dict(max_tile_rows=8)), # multi-step reduce
        ((1, 64, 64), jnp.float32, jnp.float32, jnp.int32, {}),                    # N=1 -> 2 parallel row groups
        ((3, 10, 10), jnp.float32, jnp.float32, jnp.int32, {}),                    # ragged H*W -> pad path
        ((2, 32, 32), jnp.bfloat16, jnp.bfloat16, jnp.int8, {}),                   # narrow-dtype streaming
    ]
    for shape, xdt, ydt, mdt, kw in cases:
        key, kk = jax.random.split(key)
        x, y, mask = make(shape, xdt, ydt, mdt, kk)

        loss = jax.block_until_ready(aleatoric_loss(x, y, mask, **kw))
        ref = jax.block_until_ready(_reference(x, y, mask))

        assert jnp.isfinite(loss), f"non-finite loss for {shape} {xdt}"
        assert jnp.allclose(loss, ref, rtol=1e-4, atol=1e-4), (shape, xdt, loss, ref)

    print("KERNEL_OK")
</pallas_src>

<mosaic_0001>
module attributes {stable_mosaic.version = 11 : i64} {
  func.func @_aleatoric_kernel(%arg0: i32, %arg1: i32, %arg2: i32, %arg3: memref<2x1x2x128xf32, #tpu.memory_space<vmem>>, %arg4: memref<2x1x2x128xf32, #tpu.memory_space<vmem>>, %arg5: memref<2x2x128xf32, #tpu.memory_space<vmem>>, %arg6: memref<2x2x128xi32, #tpu.memory_space<vmem>>, %arg7: memref<1x1x128xf32, #tpu.memory_space<vmem>>, %arg8: memref<1x1x128xf32, #tpu.memory_space<vmem>>) attributes {dimension_semantics = [#tpu.dimension_semantics<parallel>, #tpu.dimension_semantics<parallel>, #tpu.dimension_semantics<arbitrary>], iteration_bounds = array<i64: 1, 1, 1>, scalar_prefetch = 0 : i64, scratch_operands = 0 : i64, tpu.core_type = #tpu.core_type<tc>, window_params = [{transform_indices = @transform_0, window_bounds = array<i64: 2, 1, 2, 128>}, {transform_indices = @transform_1, window_bounds = array<i64: 2, 1, 2, 128>}, {transform_indices = @transform_2, window_bounds = array<i64: 2, 2, 128>}, {transform_indices = @transform_3, window_bounds = array<i64: 2, 2, 128>}, {transform_indices = @transform_4, window_bounds = array<i64: 1, 1, 128>}, {transform_indices = @transform_5, window_bounds = array<i64: 1, 1, 128>}]} {
    %c0_i32 = arith.constant 0 : i32
    %0 = arith.cmpi eq, %arg2, %c0_i32 : i32
    %1 = arith.extui %0 : i1 to i32
    %c0_i32_0 = arith.constant 0 : i32
    %2 = arith.cmpi ne, %1, %c0_i32_0 : i32
    scf.if %2 {
      %cst_31 = arith.constant 0.000000e+00 : f32
      %35 = vector.broadcast %cst_31 : f32 to vector<1x1x128xf32>
      %c0_32 = arith.constant 0 : index
      %c0_33 = arith.constant 0 : index
      %c0_34 = arith.constant 0 : index
      %36 = vector.load %arg7[%c0_32, %c0_33, %c0_34] : memref<1x1x128xf32, #tpu.memory_space<vmem>>, vector<1x1x128xf32>
      tpu.vector_store %arg7[%c0_32, %c0_33, %c0_34], %35 {strides = array<i32>} : memref<1x1x128xf32, #tpu.memory_space<vmem>>, vector<1x1x128xf32>,
      %cst_35 = arith.constant 0.000000e+00 : f32
      %37 = vector.broadcast %cst_35 : f32 to vector<1x1x128xf32>
      %c0_36 = arith.constant 0 : index
      %c0_37 = arith.constant 0 : index
      %c0_38 = arith.constant 0 : index
      %38 = vector.load %arg8[%c0_36, %c0_37, %c0_38] : memref<1x1x128xf32, #tpu.memory_space<vmem>>, vector<1x1x128xf32>
      tpu.vector_store %arg8[%c0_36, %c0_37, %c0_38], %37 {strides = array<i32>} : memref<1x1x128xf32, #tpu.memory_space<vmem>>, vector<1x1x128xf32>,
    } else {
    }
    %c0 = arith.constant 0 : index
    %c0_1 = arith.constant 0 : index
    %c0_2 = arith.constant 0 : index
    %c0_3 = arith.constant 0 : index
    %3 = vector.load %arg3[%c0, %c0_1, %c0_2, %c0_3] : memref<2x1x2x128xf32, #tpu.memory_space<vmem>>, vector<2x1x2x128xf32>
    %4 = vector.shape_cast %3 : vector<2x1x2x128xf32> to vector<2x2x128xf32>
    %c0_4 = arith.constant 0 : index
    %c0_5 = arith.constant 0 : index
    %c0_6 = arith.constant 0 : index
    %c0_7 = arith.constant 0 : index
    %5 = vector.load %arg4[%c0_4, %c0_5, %c0_6, %c0_7] : memref<2x1x2x128xf32, #tpu.memory_space<vmem>>, vector<2x1x2x128xf32>
    %6 = vector.shape_cast %5 : vector<2x1x2x128xf32> to vector<2x2x128xf32>
    %c0_8 = arith.constant 0 : index
    %c0_9 = arith.constant 0 : index
    %c0_10 = arith.constant 0 : index
    %7 = vector.load %arg5[%c0_8, %c0_9, %c0_10] : memref<2x2x128xf32, #tpu.memory_space<vmem>>, vector<2x2x128xf32>
    %c0_11 = arith.constant 0 : index
    %c0_12 = arith.constant 0 : index
    %c0_13 = arith.constant 0 : index
    %8 = vector.load %arg6[%c0_11, %c0_12, %c0_13] : memref<2x2x128xi32, #tpu.memory_space<vmem>>, vector<2x2x128xi32>
    %9 = arith.sitofp %8 : vector<2x2x128xi32> to vector<2x2x128xf32>
    %cst = arith.constant 1.000000e+00 : f32
    %10 = vector.broadcast %cst : f32 to vector<2x2x128xf32>
    %11 = arith.cmpf oeq, %9, %10 : vector<2x2x128xf32>
    %cst_14 = arith.constant 0.000000e+00 : f32
    %12 = vector.broadcast %cst_14 : f32 to vector<2x2x128xf32>
    %13 = arith.select %11, %6, %12 : vector<2x2x128xi1>, vector<2x2x128xf32>
    %14 = arith.subf %4, %7 : vector<2x2x128xf32>
    %cst_15 = arith.constant 0.000000e+00 : f32
    %15 = vector.broadcast %cst_15 : f32 to vector<2x2x128xf32>
    %16 = arith.select %11, %14, %15 : vector<2x2x128xi1>, vector<2x2x128xf32>
    %cst_16 = arith.constant 0.000000e+00 : f32
    %17 = vector.broadcast %cst_16 : f32 to vector<2x2x128xf32>
    %18 = arith.subf %17, %13 : vector<2x2x128xf32>
    %19 = math.exp %18 : vector<2x2x128xf32>
    %20 = math.absf %16 : vector<2x2x128xf32>
    %21 = arith.mulf %19, %20 : vector<2x2x128xf32>
    %22 = arith.addf %21, %13 : vector<2x2x128xf32>
    %c0_17 = arith.constant 0 : index
    %c0_18 = arith.constant 0 : index
    %c0_19 = arith.constant 0 : index
    %23 = vector.load %arg7[%c0_17, %c0_18, %c0_19] : memref<1x1x128xf32, #tpu.memory_space<vmem>>, vector<1x1x128xf32>
    %cst_20 = arith.constant dense<0.000000e+00> : vector<128xf32>
    %24 = vector.multi_reduction <add>, %22, %cst_20 [0, 1] : vector<2x2x128xf32> to vector<128xf32>
    %25 = vector.shape_cast %24 : vector<128xf32> to vector<1x1x128xf32>
    %26 = arith.addf %23, %25 : vector<1x1x128xf32>
    %c0_21 = arith.constant 0 : index
    %c0_22 = arith.constant 0 : index
    %c0_23 = arith.constant 0 : index
    %27 = vector.load %arg7[%c0_21, %c0_22, %c0_23] : memref<1x1x128xf32, #tpu.memory_space<vmem>>, vector<1x1x128xf32>
    tpu.vector_store %arg7[%c0_21, %c0_22, %c0_23], %26 {strides = array<i32>} : memref<1x1x128xf32, #tpu.memory_space<vmem>>, vector<1x1x128xf32>,
    %c0_24 = arith.constant 0 : index
    %c0_25 = arith.constant 0 : index
    %c0_26 = arith.constant 0 : index
    %28 = vector.load %arg8[%c0_24, %c0_25, %c0_26] : memref<1x1x128xf32, #tpu.memory_space<vmem>>, vector<1x1x128xf32>
    %29 = arith.extui %11 : vector<2x2x128xi1> to vector<2x2x128xi32>
    %30 = arith.sitofp %29 : vector<2x2x128xi32> to vector<2x2x128xf32>
    %cst_27 = arith.constant dense<0.000000e+00> : vector<128xf32>
    %31 = vector.multi_reduction <add>, %30, %cst_27 [0, 1] : vector<2x2x128xf32> to vector<128xf32>
    %32 = vector.shape_cast %31 : vector<128xf32> to vector<1x1x128xf32>
    %33 = arith.addf %28, %32 : vector<1x1x128xf32>
    %c0_28 = arith.constant 0 : index
    %c0_29 = arith.constant 0 : index
    %c0_30 = arith.constant 0 : index
    %34 = vector.load %arg8[%c0_28, %c0_29, %c0_30] : memref<1x1x128xf32, #tpu.memory_space<vmem>>, vector<1x1x128xf32>
    tpu.vector_store %arg8[%c0_28, %c0_29, %c0_30], %33 {strides = array<i32>} : memref<1x1x128xf32, #tpu.memory_space<vmem>>, vector<1x1x128xf32>,
    return
  }
  func.func @transform_0(%arg0: i32, %arg1: i32, %arg2: i32) -> (i32, i32, i32, i32) {
    %c1_i32 = arith.constant 1 : i32
    %0 = arith.muli %arg1, %c1_i32 : i32
    %1 = arith.addi %0, %arg2 : i32
    %c0_i32 = arith.constant 0 : i32
    %c0_i32_0 = arith.constant 0 : i32
    %c0_i32_1 = arith.constant 0 : i32
    return %arg0, %c0_i32, %1, %c0_i32_0 : i32, i32, i32, i32
  }
  func.func @transform_1(%arg0: i32, %arg1: i32, %arg2: i32) -> (i32, i32, i32, i32) {
    %c1_i32 = arith.constant 1 : i32
    %0 = arith.muli %arg1, %c1_i32 : i32
    %1 = arith.addi %0, %arg2 : i32
    %c1_i32_0 = arith.constant 1 : i32
    %c0_i32 = arith.constant 0 : i32
    %c0_i32_1 = arith.constant 0 : i32
    return %arg0, %c1_i32_0, %1, %c0_i32 : i32, i32, i32, i32
  }
  func.func @transform_2(%arg0: i32, %arg1: i32, %arg2: i32) -> (i32, i32, i32) {
    %c1_i32 = arith.constant 1 : i32
    %0 = arith.muli %arg1, %c1_i32 : i32
    %1 = arith.addi %0, %arg2 : i32
    %c0_i32 = arith.constant 0 : i32
    %c0_i32_0 = arith.constant 0 : i32
    return %arg0, %1, %c0_i32 : i32, i32, i32
  }
  func.func @transform_3(%arg0: i32, %arg1: i32, %arg2: i32) -> (i32, i32, i32) {
    %c1_i32 = arith.constant 1 : i32
    %0 = arith.muli %arg1, %c1_i32 : i32
    %1 = arith.addi %0, %arg2 : i32
    %c0_i32 = arith.constant 0 : i32
    %c0_i32_0 = arith.constant 0 : i32
    return %arg0, %1, %c0_i32 : i32, i32, i32
  }
  func.func @transform_4(%arg0: i32, %arg1: i32, %arg2: i32) -> (i32, i32, i32) {
    %c1_i32 = arith.constant 1 : i32
    %0 = arith.muli %arg0, %c1_i32 : i32
    %1 = arith.addi %0, %arg1 : i32
    %c0_i32 = arith.constant 0 : i32
    %c0_i32_0 = arith.constant 0 : i32
    %c0_i32_1 = arith.constant 0 : i32
    return %1, %c0_i32, %c0_i32_0 : i32, i32, i32
  }
  func.func @transform_5(%arg0: i32, %arg1: i32, %arg2: i32) -> (i32, i32, i32) {
    %c1_i32 = arith.constant 1 : i32
    %0 = arith.muli %arg0, %c1_i32 : i32
    %1 = arith.addi %0, %arg1 : i32
    %c0_i32 = arith.constant 0 : i32
    %c0_i32_0 = arith.constant 0 : i32
    %c0_i32_1 = arith.constant 0 : i32
    return %1, %c0_i32, %c0_i32_0 : i32, i32, i32
  }
}

</mosaic_0001>

<bundles_post_ra>
// kernel: tpu_custom_call.1
= control target key start
LH: loop header
LB: loop body
LE: loop exit
PB: predicated region body
PF: predicated region fallthrough
CT: control target
= control target key end

     0   :  { %11 = vsyncpa [#allocation3], 0  ;;  %s460_s0 = inlined_call_operand.hbm [shape: f32[2,2,2,128], index: 0, kind: input, shape index: {}]   ;;  %s461_s1 = inlined_call_operand.hbm [shape: f32[2,2,2,128], index: 1, kind: input, shape index: {}]   ;;  %s462_s2 = inlined_call_operand.hbm [shape: f32[2,2,128], index: 2, kind: input, shape index: {}]   ;;  %s463_s3 = inlined_call_operand.hbm [shape: s32[2,2,128], index: 3, kind: input, shape index: {}]   ;;  %s464_s4 = inlined_call_operand.hbm [shape: f32[1,1,128], index: 4, kind: output, shape index: {0}]   ;;  %s465_s5 = inlined_call_operand.hbm [shape: f32[1,1,128], index: 5, kind: output, shape index: {1}]  }
   0x1   :  { %12 = vsyncpa [#allocation6], 0 }
   0x2   :  { %13 = vsyncpa [#allocation9], 0 }
   0x3   :  { %14 = vsyncpa [#allocation4], 0 }
   0x4   :  { %15 = vsyncpa [#allocation12], 0  ;;  %s207_s20 = scalar_lea.hbm %s461_s1, 2  ;;  %s378_s22 = smov [#allocation5]  }
   0x5   :  { %s40_s21 = sshll.u32 %s207_s20, 4  ;;  %s42_s23 = sshll.u32 %s378_s22, 4  ;;  %s41_s21 = int_to_ptr.hbm [resolvable:$true] %s40_s21  ;;  %s43_s23 = int_to_ptr.vmem [resolvable:$true] %s42_s23 }
   0x6   :  { %s23_s26 = sshll.u32 %s460_s0, 4  ;;  %s379_s27 = smov 64   ;;  %s24_s26 = int_to_ptr.hbm [resolvable:$true] %s23_s26 }
   0x7   :  { %s380_s28 = smov 32   ;;  %s381_s29 = smov 2  }
   0x8   :  { %48 = dma.hbm_to_vmem [thread:$0]  %s41_s21, 64, %s43_s23, [#allocation6], %s379_s27, %s380_s28, %s381_s29  }
   0x9   :  { %s382_s30 = smov [#allocation2]   ;;  %s56_s1 = sshll.u32 %s462_s2, 4  ;;  %s57_s1 = int_to_ptr.hbm [resolvable:$true] %s56_s1 }
   0xa   :  { %s25_s6 = sshll.u32 %s382_s30, 4  ;;  %s72_s11 = sshll.u32 %s463_s3, 4  ;;  %s26_s6 = int_to_ptr.vmem [resolvable:$true] %s25_s6  ;;  %s73_s11 = int_to_ptr.hbm [resolvable:$true] %s72_s11 }
   0xb   :  { %31 = dma.hbm_to_vmem [thread:$0]  %s24_s26, 64, %s26_s6, [#allocation3], %s379_s27, %s380_s28, %s381_s29  }
   0xc   :  { %s383_s12 = smov [#allocation7]   ;;  %s384_s13 = smov [#allocation8]  }
   0xd   :  { %s58_s0 = sshll.u32 %s383_s12, 4  ;;  %s74_s14 = sshll.u32 %s384_s13, 4  ;;  %s59_s0 = int_to_ptr.vmem [resolvable:$true] %s58_s0  ;;  %s75_s14 = int_to_ptr.vmem [resolvable:$true] %s74_s14 }
   0xe   :  { %64 = dma.hbm_to_vmem [thread:$0]  %s57_s1, 64, %s59_s0, [#allocation6], %s380_s28, %s380_s28, %s381_s29  }
   0xf   :  { %80 = dma.hbm_to_vmem [thread:$0]  %s73_s11, 64, %s75_s14, [#allocation9], %s380_s28, %s380_s28, %s381_s29  }
  0x10   :  { %368 = dma.done.wait [#allocation3], 64  }
  0x11   :  { %369 = vsyncadd [#allocation3], 4294967232 }
  0x12   :  { %370 = dma.done.wait [#allocation6], 128  }
  0x13   :  { %371 = vsyncadd [#allocation6], 4294967168 }
  0x14   :  { %372 = dma.done.wait [#allocation9], 64  }
  0x15   :  { %373 = vsyncadd [#allocation9], 4294967232  ;;  %v385_v0 = vmov 0.0   ;;  %v115_v1 = vld [vmem:[#allocation8] sm:$0x3]  ;;  %vm140_vm2 = vcmask 1041408  }
  0x16   :  { %107 = vst [vmem:[#allocation10] sm:$0x1] %v385_v0  ;;  %v116_v2 = vld [vmem:[#allocation8 + $0x2] sm:$0x3]  ;;  %v111_v3 = vld [vmem:[#allocation5] sm:$0x3]  ;;  %v117_v5 = vcvt.s32.f32 %v115_v1 }
  0x17   :  { %108 = vst [vmem:[#allocation11] sm:$0x1] %v385_v0  ;;  %v112_v4 = vld [vmem:[#allocation5 + $0x2] sm:$0x3]  ;;  %v118_v6 = vcvt.s32.f32 %v116_v2  ;;  %v109_v7 = vld [vmem:[#allocation2] sm:$0x3] }
  0x18   :  { %v113_v8 = vld [vmem:[#allocation7] sm:$0x3]  ;;  %v110_v9 = vld [vmem:[#allocation2 + $0x2] sm:$0x3]  ;;  %v114_v10 = vld [vmem:[#allocation7 + $0x2] sm:$0x3] }
  0x19   :  { %vm430_vm0 = vcmp.eq.f32.partialorder %v117_v5, 1.0  ;;  %vm434_vm1 = vcmp.eq.f32.partialorder %v118_v6, 1.0  ;;  %v123_v15 = vsub.f32 %v109_v7, %v113_v8  ;;  %v124_v18 = vsub.f32 %v110_v9, %v114_v10  ;;  %s386_s2 = smov [#allocation11]   ;;  %s190_s17 = sshll.u32 %s465_s5, 4  ;;  %s191_s17 = int_to_ptr.hbm [resolvable:$true] %s190_s17 }
  0x1a   :  { %v121_v13 = vsel %vm430_vm0, %v111_v3, 0.0  ;;  %v122_v14 = vsel %vm434_vm1, %v112_v4, 0.0  ;;  %v208_v19 = vsel %vm430_vm0, 1.0, %v385_v0  ;;  %v209_v20 = vsel %vm434_vm1, 1.0, %v385_v0  ;;  %s188_s3 = sshll.u32 %s386_s2, 4  ;;  %s387_s18 = smov [#allocation10]   ;;  %s189_s3 = int_to_ptr.vmem [resolvable:$true] %s188_s3 }
  0x1b   :  { %v127_v16 = vsub.f32 0.0, %v121_v13  ;;  %v128_v17 = vsub.f32 0.0, %v122_v14  ;;  %v157_v23 = vsel %vm140_vm2, %v208_v19, 0.0  ;;  %v158_v24 = vsel %vm140_vm2, %v209_v20, 0.0  ;;  %s175_s19 = sshll.u32 %s387_s18, 4  ;;  %s177_s21 = sshll.u32 %s464_s4, 4  ;;  %s176_s19 = int_to_ptr.vmem [resolvable:$true] %s175_s19  ;;  %s178_s21 = int_to_ptr.hbm [resolvable:$true] %s177_s21 }
  0x1c   :  { %v159_v25 = vadd.f32 %v158_v24, %v157_v23  ;;  %v125_v26 = vsel %vm430_vm0, %v123_v15, 0.0  ;;  %v126_v27 = vsel %vm434_vm1, %v124_v18, 0.0 }
  0x1d   :  { %v129_v21 = vmul.f32 1.442695, %v127_v16  ;;  %v131_v22 = vmul.f32 1.442695, %v128_v17  ;;  %v133_v29 = vand.u32 2147483647, %v125_v26 }
  0x1e   :  { %v160_v28 = vrot.slane %v159_v25, 4  ;;  %v134_v31 = vand.u32 2147483647, %v126_v27  ;;  %v152_v41 = vld [vmem:[#allocation11] sm:$0x1] }
  0x1f   :  { %220 = vpow2.f32 %v129_v21  ;;  %v139_v52 = vld [vmem:[#allocation10] sm:$0x1] }
  0x20   :  { %222 = vpow2.f32 %v131_v22  ;;  %v161_v30 = vadd.f32 %v160_v28, %v159_v25 }
  0x22   :  { %v162_v32 = vrot.slane %v161_v30, 2 }
  0x24   :  { %v163_v36 = vadd.f32 %v162_v32, %v161_v30 }
  0x25   :  { %v221_v33 = vpop.eup %220 }
  0x26   :  { %v223_v34 = vpop.eup %222  ;;  %v135_v35 = vmul.f32 %v221_v33, %v133_v29  ;;  %v164_v39 = vrot.slane %v163_v36, 1 }
  0x27   :  { %v136_v37 = vmul.f32 %v223_v34, %v134_v31 }
  0x28   :  { %v137_v38 = vadd.f32 %v135_v35, %v121_v13  ;;  %v165_v43 = vadd.f32 %v164_v39, %v163_v36 }
  0x29   :  { %v138_v40 = vadd.f32 %v136_v37, %v122_v14 }
  0x2a   :  { %v141_v42 = vsel %vm140_vm2, %v137_v38, 0.0  ;;  %v166_v46 = vadd.f32 %v165_v43, %v152_v41 }
  0x2b   :  { %v142_v44 = vsel %vm140_vm2, %v138_v40, 0.0 }
  0x2c   :  { %v143_v45 = vadd.f32 %v142_v44, %v141_v42  ;;  %167 = vst [vmem:[#allocation11] sm:$0x1] %v166_v46 }
  0x2d   :  { %193 = dma.vmem_to_hbm [thread:$0]  %s189_s3, 16, %s191_s17, [#allocation12]  }
  0x2e   :  { %v144_v47 = vrot.slane %v143_v45, 4 }
  0x30   :  { %v145_v48 = vadd.f32 %v144_v47, %v143_v45 }
  0x32   :  { %v146_v49 = vrot.slane %v145_v48, 2 }
  0x34   :  { %v147_v50 = vadd.f32 %v146_v49, %v145_v48 }
  0x36   :  { %v148_v51 = vrot.slane %v147_v50, 1 }
  0x38   :  { %v149_v53 = vadd.f32 %v148_v51, %v147_v50 }
  0x3a   :  { %v150_v54 = vadd.f32 %v149_v53, %v139_v52 }
  0x3c   :  { %151 = vst [vmem:[#allocation10] sm:$0x1] %v150_v54 }
  0x3d   :  { %180 = dma.vmem_to_hbm [thread:$0]  %s176_s19, 16, %s178_s21, [#allocation4]  }
  0x3e   :  { %374 = dma.done.wait [#allocation4], 16  }
  0x3f   :  { %375 = vsyncadd [#allocation4], 4294967280 }
  0x40   :  { %376 = dma.done.wait [#allocation12], 16  }
  0x41   :  { %377 = vsyncadd [#allocation12], 4294967280 }
  0x42   :  { %202 = vsyncpa [#allocation3], 1 }
  0x43   :  { %203 = vsyncpa [#allocation6], 1 }
  0x44   :  { %204 = vsyncpa [#allocation9], 1 }
  0x45   :  { %205 = vsyncpa [#allocation4], 1 }
  0x46   :  { %206 = vsyncpa [#allocation12], 1 }

</bundles_post_ra>
